<compile_context>
chip_gen: v7x
topology: tpu7x:2x2x1
jax: 0.10.0
libtpu: 0.0.40
codegen_flags: <defaults>
</compile_context>

<pallas_src>
import functools
import math

import jax
import jax.numpy as jnp
from jax import lax
from jax.experimental import pallas as pl
from jax.experimental.pallas import tpu as pltpu


# ----------------------------------------------------------------------------
# Generic M-tiled linear kernel (used for v_proj only)
# ----------------------------------------------------------------------------
def _linear_kernel(x_ref, w_ref, b_ref, o_ref, *, activation):
    y = jnp.dot(x_ref[...], w_ref[...], preferred_element_type=jnp.float32)
    y = y + b_ref[...]
    if activation == "tanh":
        y = jnp.tanh(y)
    o_ref[...] = y.astype(o_ref.dtype)


def linear(x, w, b, activation=None):
    """y = x @ w + b (optionally tanh).  x:(M,K)  w:(K,N)  b:(1,N)."""
    M, K = x.shape
    _, N = w.shape
    tm = M
    for cand in (512, 256, 128):
        if M % cand == 0:
            tm = cand
            break
    kern = functools.partial(_linear_kernel, activation=activation)
    return pl.pallas_call(
        kern,
        out_shape=jax.ShapeDtypeStruct((M, N), jnp.float32),
        grid=(M // tm,),
        in_specs=[
            pl.BlockSpec((tm, K), lambda i: (i, 0)),
            pl.BlockSpec((K, N), lambda i: (0, 0)),
            pl.BlockSpec((1, N), lambda i: (0, 0)),
        ],
        out_specs=pl.BlockSpec((tm, N), lambda i: (i, 0)),
        compiler_params=pltpu.CompilerParams(
            dimension_semantics=("parallel",)),
    )(x, w, b)


# ----------------------------------------------------------------------------
# Fused bidirectional LSTM + (q|h)_proj:  grid = (2 streams, T)
#   stream 0 = all questions, stream 1 = all history rounds (batched over
#   B * n_round).  Emits only the projected final states (S, Bf, H).
# ----------------------------------------------------------------------------
def _bilstm_kernel(lens_ref, xf_ref, xb_ref,
                   wih_f_ref, whh_f_ref, bf_ref,
                   wih_b_ref, whh_b_ref, bb_ref,
                   pw_ref, pb_ref,
                   out_ref,
                   hf, cf, hb, cb, *, T, H):
    t = pl.program_id(1)

    @pl.when(t == 0)
    def _():
        hf[...] = jnp.zeros_like(hf)
        cf[...] = jnp.zeros_like(cf)
        hb[...] = jnp.zeros_like(hb)
        cb[...] = jnp.zeros_like(cb)

    lens = lens_ref[0]                                    # (Bf, 1) int32

    def cell(x_t, h_prev, c_prev, wih, whh, b, valid):
        gates = (jnp.dot(x_t, wih, preferred_element_type=jnp.float32)
                 + jnp.dot(h_prev, whh, preferred_element_type=jnp.float32)
                 + b)                                     # (Bf, 4H)  i,f,g,o
        i_g = jax.nn.sigmoid(gates[:, 0:H])
        f_g = jax.nn.sigmoid(gates[:, H:2 * H])
        g_g = jnp.tanh(gates[:, 2 * H:3 * H])
        o_g = jax.nn.sigmoid(gates[:, 3 * H:4 * H])
        c_new = f_g * c_prev + i_g * g_g
        h_new = o_g * jnp.tanh(c_new)
        h_out = jnp.where(valid, h_new, h_prev)           # length masking ==
        c_out = jnp.where(valid, c_new, c_prev)           # packed-sequence RNN
        return h_out, c_out

    # forward direction processes original position t
    h_f, c_f = cell(xf_ref[0, 0], hf[...], cf[...],
                    wih_f_ref[0], whh_f_ref[0], bf_ref[0], lens > t)
    # backward direction processes original position T-1-t
    h_b, c_b = cell(xb_ref[0, 0], hb[...], cb[...],
                    wih_b_ref[0], whh_b_ref[0], bb_ref[0], lens > (T - 1 - t))
    hf[...] = h_f
    cf[...] = c_f
    hb[...] = h_b
    cb[...] = c_b

    # Epilogue: fwd state at len-1 (carried to T-1 by the mask) and bwd state
    # at position 0, concatenated and projected -- fused (q|h)_proj.
    @pl.when(t == T - 1)
    def _():
        cat = jnp.concatenate([hf[...], hb[...]], axis=-1)      # (Bf, 2H)
        out = (jnp.dot(cat, pw_ref[0], preferred_element_type=jnp.float32)
               + pb_ref[0])
        out_ref[0] = out.astype(out_ref.dtype)


def bilstm_encode(x, lens, rnn, proj_w, proj_b, H):
    """x:(2, T, Bf, E) time-major, lens:(2, Bf, 1) int32.  Returns (2, Bf, H)."""
    S, T, Bf, E = x.shape
    kern = functools.partial(_bilstm_kernel, T=T, H=H)
    flops = 2 * S * T * 2 * (Bf * E * 4 * H + Bf * H * 4 * H) \
        + 2 * S * Bf * 2 * H * H
    trans = S * T * 2 * Bf * 5 * H
    bytes_acc = 4 * (2 * x.size + 2 * rnn["wih_f"].size + 2 * rnn["whh_f"].size
                     + proj_w.size + S * Bf * H)
    return pl.pallas_call(
        kern,
        out_shape=jax.ShapeDtypeStruct((S, Bf, H), jnp.float32),
        grid=(S, T),
        in_specs=[
            pl.BlockSpec((1, Bf, 1), lambda s, t: (s, 0, 0)),          # lens
            pl.BlockSpec((1, 1, Bf, E), lambda s, t: (s, t, 0, 0)),    # x fwd
            pl.BlockSpec((1, 1, Bf, E),
                         lambda s, t: (s, T - 1 - t, 0, 0)),           # x bwd
            pl.BlockSpec((1, E, 4 * H), lambda s, t: (s, 0, 0)),       # W_ih f
            pl.BlockSpec((1, H, 4 * H), lambda s, t: (s, 0, 0)),       # W_hh f
            pl.BlockSpec((1, 1, 4 * H), lambda s, t: (s, 0, 0)),       # b f
            pl.BlockSpec((1, E, 4 * H), lambda s, t: (s, 0, 0)),       # W_ih b
            pl.BlockSpec((1, H, 4 * H), lambda s, t: (s, 0, 0)),       # W_hh b
            pl.BlockSpec((1, 1, 4 * H), lambda s, t: (s, 0, 0)),       # b b
            pl.BlockSpec((1, 2 * H, H), lambda s, t: (s, 0, 0)),       # proj_w
            pl.BlockSpec((1, 1, H), lambda s, t: (s, 0, 0)),           # proj_b
        ],
        out_specs=pl.BlockSpec((1, Bf, H), lambda s, t: (s, 0, 0)),
        scratch_shapes=[pltpu.VMEM((Bf, H), jnp.float32)] * 4,  # h_f,c_f,h_b,c_b
        compiler_params=pltpu.CompilerParams(
            dimension_semantics=("parallel", "arbitrary")),
        cost_estimate=pl.CostEstimate(flops=flops, transcendentals=trans,
                                      bytes_accessed=bytes_acc),
    )(lens, x, x, rnn["wih_f"], rnn["whh_f"], rnn["b_f"],
      rnn["wih_b"], rnn["whh_b"], rnn["b_b"], proj_w, proj_b)


# ----------------------------------------------------------------------------
# Fused backbone + j_proj over all rounds:  grid = (n_round,)
#   n_valid = program_id(0) + 1 drives the history mask; attention scores /
#   contexts are MXU einsums; memory & img_feat blocks stay VMEM-resident.
# ----------------------------------------------------------------------------
def _backbone_kernel(qf_ref, mem_ref, img_ref, jw_ref, jb_ref,
                     enc_ref, disc_ref, *, scale):
    i = pl.program_id(0)                                  # round index
    q = qf_ref[0]                                         # (B, H)
    mem = mem_ref[...]                                    # (B, Nr, H)
    img = img_ref[...]                                    # (B, R, H)
    Nr = mem_ref.shape[1]

    # question-guided per-region query attends over the valid history entries
    gq = img * q[:, None, :]                                              # (B,R,H)
    logits = jnp.einsum('brh,bnh->brn', gq, mem,
                        preferred_element_type=jnp.float32) * scale       # (B,R,Nr)
    valid = lax.broadcasted_iota(jnp.int32, (1, 1, Nr), 2) <= i           # n < i+1
    logits = jnp.where(valid, logits, jnp.float32(-1e30))
    logits = logits - jnp.max(logits, axis=-1, keepdims=True)
    e = jnp.where(valid, jnp.exp(logits), jnp.float32(0.0))
    att = e / jnp.sum(e, axis=-1, keepdims=True)                          # (B,R,Nr)

    h_att = jnp.einsum('brn,bnh->brh', att, mem,
                       preferred_element_type=jnp.float32)                # (B,R,H)
    fused = img + h_att

    reg = jnp.sum(fused * q[:, None, :], axis=-1) * scale                 # (B,R)
    reg = reg - jnp.max(reg, axis=-1, keepdims=True)
    re = jnp.exp(reg)
    alpha = re / jnp.sum(re, axis=-1, keepdims=True)                      # (B,R)

    z = jnp.sum(alpha[:, :, None] * fused, axis=1) + q                    # (B,H)
    # fused j_proj + tanh
    enc = jnp.tanh(jnp.dot(z, jw_ref[...], preferred_element_type=jnp.float32)
                   + jb_ref[...])
    enc_ref[0] = enc.astype(enc_ref.dtype)
    # mean over regions == torch.mean(disc, 1); padded rounds already zero
    disc_ref[0] = jnp.mean(att, axis=1).astype(disc_ref.dtype)


def backbone_all(q_feats, memory, img_feat, jw, jb):
    """q_feats:(Nr,B,H), memory:(B,Nr,H), img_feat:(B,R,H).
    Returns enc:(Nr,B,H) (j_proj+tanh applied), disc:(Nr,B,Nr)."""
    Nr, B, H = q_feats.shape
    R = img_feat.shape[1]
    kern = functools.partial(_backbone_kernel, scale=1.0 / math.sqrt(H))
    flops = Nr * (4 * B * R * Nr * H + 2 * B * H * H + 4 * B * R * H)
    trans = Nr * B * (R * (Nr + 1) + H)
    bytes_acc = 4 * (q_feats.size + memory.size + img_feat.size + jw.size
                     + Nr * B * H + Nr * B * Nr)
    return pl.pallas_call(
        kern,
        out_shape=(jax.ShapeDtypeStruct((Nr, B, H), jnp.float32),
                   jax.ShapeDtypeStruct((Nr, B, Nr), jnp.float32)),
        grid=(Nr,),
        in_specs=[
            pl.BlockSpec((1, B, H), lambda i: (i, 0, 0)),     # q_feat per round
            pl.BlockSpec((B, Nr, H), lambda i: (0, 0, 0)),    # full memory (resident)
            pl.BlockSpec((B, R, H), lambda i: (0, 0, 0)),     # img feats (resident)
            pl.BlockSpec((H, H), lambda i: (0, 0)),           # j_proj_w
            pl.BlockSpec((1, H), lambda i: (0, 0)),           # j_proj_b
        ],
        out_specs=(pl.BlockSpec((1, B, H), lambda i: (i, 0, 0)),
                   pl.BlockSpec((1, B, Nr), lambda i: (i, 0, 0))),
        compiler_params=pltpu.CompilerParams(
            dimension_semantics=("parallel",)),
        cost_estimate=pl.CostEstimate(flops=flops, transcendentals=trans,
                                      bytes_accessed=bytes_acc),
    )(q_feats, memory, img_feat, jw, jb)


# ----------------------------------------------------------------------------
# GLAN forward (glue in plain JAX, hot paths in 3 Pallas calls)
# ----------------------------------------------------------------------------
def glan_forward(params, batch):
    q, ql = batch["ques"], batch["ques_len"]
    h, hl = batch["hist"], batch["hist_len"]
    v = batch["img_feat"]

    B, n_round, T = q.shape
    R = v.shape[1]
    H = params["H"]
    Bf = B * n_round

    # v_proj (weight-norm linear at init == plain linear)
    img_feat = linear(v.reshape(B * R, -1),
                      params["v_proj_w"], params["v_proj_b"]).reshape(B, R, H)

    # ---- flatten all rounds into one big batch for both language streams ----
    # questions flattened round-major -> output reshapes to (n_round, B, H)
    q_tok = jnp.transpose(q, (1, 0, 2)).reshape(Bf, T)
    q_len = jnp.transpose(ql, (1, 0)).reshape(Bf)
    # history flattened batch-major -> output reshapes to (B, n_round, H) memory
    h_tok = h.reshape(Bf, T)
    h_len = hl.reshape(Bf)

    emb = params["word_embed"]
    q_emb = jnp.transpose(jnp.take(emb, q_tok, axis=0), (1, 0, 2))   # (T, Bf, E)
    h_emb = jnp.transpose(jnp.take(emb, h_tok, axis=0), (1, 0, 2))   # (T, Bf, E)
    x = jnp.stack([q_emb, h_emb], axis=0)                            # (2, T, Bf, E)
    lens = jnp.stack([q_len, h_len], axis=0).astype(jnp.int32).reshape(2, Bf, 1)

    # one fused bidirectional LSTM + projection call for everything
    feats = bilstm_encode(x, lens, params["rnn"],
                          params["seq_proj_w"], params["seq_proj_b"], H)
    q_feats = feats[0].reshape(n_round, B, H)          # per-round question emb
    memory = feats[1].reshape(B, n_round, H)           # full history memory

    # one fused backbone(+j_proj) call over all rounds
    enc, disc = backbone_all(q_feats, memory, img_feat,
                             params["j_proj_w"], params["j_proj_b"])
    enc_out = jnp.transpose(enc, (1, 0, 2))            # (B, n_round, H)
    structure = jnp.transpose(disc, (1, 0, 2))         # (B, n_round, n_round)
    return enc_out, structure


# ----------------------------------------------------------------------------
# Deterministic parameter / input construction
# ----------------------------------------------------------------------------
def init_params(key, vocab, E, H, img_feature_size):
    ks = iter(jax.random.split(key, 40))

    def w(shape, scale=0.1):
        return (scale * jax.random.normal(next(ks), shape)).astype(jnp.float32)

    # stream index 0 = question encoder, 1 = history encoder
    def stacked(shape):
        return jnp.stack([w(shape), w(shape)], axis=0)

    word_embed = w((vocab, E)).at[0].set(0.0)          # padding_idx = 0

    return {
        "H": H,
        "word_embed": word_embed,
        "rnn": {
            "wih_f": stacked((E, 4 * H)), "whh_f": stacked((H, 4 * H)),
            "b_f": stacked((1, 4 * H)),
            "wih_b": stacked((E, 4 * H)), "whh_b": stacked((H, 4 * H)),
            "b_b": stacked((1, 4 * H)),
        },
        "seq_proj_w": stacked((2 * H, H)),             # [q_proj, h_proj]
        "seq_proj_b": stacked((1, H)),
        "v_proj_w": w((img_feature_size, H)), "v_proj_b": w((1, H)),
        "j_proj_w": w((H, H)),                "j_proj_b": w((1, H)),
    }


if __name__ == "__main__":
    B, n_round, T = 2, 4, 8
    vocab, E, H = 50, 16, 32
    R, img_feature_size = 8, 64

    key = jax.random.PRNGKey(0)
    kp, kq, kh, kql, khl, kv = jax.random.split(key, 6)

    params = init_params(kp, vocab, E, H, img_feature_size)
    batch = {
        "ques": jax.random.randint(kq, (B, n_round, T), 1, vocab).astype(jnp.int32),
        "ques_len": jax.random.randint(kql, (B, n_round), 1, T + 1).astype(jnp.int32),
        "hist": jax.random.randint(kh, (B, n_round, T), 1, vocab).astype(jnp.int32),
        "hist_len": jax.random.randint(khl, (B, n_round), 1, T + 1).astype(jnp.int32),
        "img_feat": (0.1 * jax.random.normal(kv, (B, R, img_feature_size))
                     ).astype(jnp.float32),
    }

    enc_out, structure = glan_forward(params, batch)
    jax.block_until_ready((enc_out, structure))
    assert enc_out.shape == (B, n_round, H)
    assert structure.shape == (B, n_round, n_round)
    print("KERNEL_OK")
</pallas_src>

<mosaic_0001>
module attributes {stable_mosaic.version = 11 : i64} {
  func.func @_linear_kernel(%arg0: i32, %arg1: memref<16x64xf32, #tpu.memory_space<vmem>>, %arg2: memref<64x32xf32, #tpu.memory_space<vmem>>, %arg3: memref<1x32xf32, #tpu.memory_space<vmem>>, %arg4: memref<16x32xf32, #tpu.memory_space<vmem>>) attributes {dimension_semantics = [#tpu.dimension_semantics<parallel>], iteration_bounds = array<i64: 1>, scalar_prefetch = 0 : i64, scratch_operands = 0 : i64, tpu.core_type = #tpu.core_type<tc>, window_params = [{transform_indices = @transform_0, window_bounds = array<i64: 16, 64>}, {pipeline_mode = #tpu.pipeline_mode<synchronous>, transform_indices = @transform_1, window_bounds = array<i64: 64, 32>}, {pipeline_mode = #tpu.pipeline_mode<synchronous>, transform_indices = @transform_2, window_bounds = array<i64: 1, 32>}, {transform_indices = @transform_3, window_bounds = array<i64: 16, 32>}]} {
    %c0 = arith.constant 0 : index
    %c0_0 = arith.constant 0 : index
    %0 = vector.load %arg1[%c0, %c0_0] : memref<16x64xf32, #tpu.memory_space<vmem>>, vector<16x64xf32>
    %c0_1 = arith.constant 0 : index
    %c0_2 = arith.constant 0 : index
    %1 = vector.load %arg2[%c0_1, %c0_2] : memref<64x32xf32, #tpu.memory_space<vmem>>, vector<64x32xf32>
    %cst = arith.constant dense<0.000000e+00> : vector<16x32xf32>
    %2 = tpu.matmul %0, %1, %cst {dimension_numbers = #tpu.dot_dimension_numbers<[1], [0], [0], [1], [0, 0, 1, 1], [], []>} : vector<16x64xf32>, vector<64x32xf32>, vector<16x32xf32> -> vector<16x32xf32>
    %c0_3 = arith.constant 0 : index
    %c0_4 = arith.constant 0 : index
    %3 = vector.load %arg3[%c0_3, %c0_4] : memref<1x32xf32, #tpu.memory_space<vmem>>, vector<1x32xf32>
    %4 = vector.broadcast %3 : vector<1x32xf32> to vector<16x32xf32>
    %5 = arith.addf %2, %4 : vector<16x32xf32>
    %c0_5 = arith.constant 0 : index
    %c0_6 = arith.constant 0 : index
    %6 = vector.load %arg4[%c0_5, %c0_6] : memref<16x32xf32, #tpu.memory_space<vmem>>, vector<16x32xf32>
    tpu.vector_store %arg4[%c0_5, %c0_6], %5 {strides = array<i32>} : memref<16x32xf32, #tpu.memory_space<vmem>>, vector<16x32xf32>,
    return
  }
  func.func @transform_0(%arg0: i32) -> (i32, i32) {
    %c0_i32 = arith.constant 0 : i32
    %c0_i32_0 = arith.constant 0 : i32
    return %arg0, %c0_i32 : i32, i32
  }
  func.func @transform_1(%arg0: i32) -> (i32, i32) {
    %c0_i32 = arith.constant 0 : i32
    %c0_i32_0 = arith.constant 0 : i32
    %c0_i32_1 = arith.constant 0 : i32
    return %c0_i32, %c0_i32_0 : i32, i32
  }
  func.func @transform_2(%arg0: i32) -> (i32, i32) {
    %c0_i32 = arith.constant 0 : i32
    %c0_i32_0 = arith.constant 0 : i32
    %c0_i32_1 = arith.constant 0 : i32
    return %c0_i32, %c0_i32_0 : i32, i32
  }
  func.func @transform_3(%arg0: i32) -> (i32, i32) {
    %c0_i32 = arith.constant 0 : i32
    %c0_i32_0 = arith.constant 0 : i32
    return %arg0, %c0_i32 : i32, i32
  }
}

</mosaic_0001>

<bundles_post_ra>
// kernel: tpu_custom_call.1
= control target key start
LH: loop header
LB: loop body
LE: loop exit
PB: predicated region body
PF: predicated region fallthrough
CT: control target
= control target key end

     0   :  { %vm32_vm0 = vcmask 523264   ;;  %s278_s0 = inlined_call_operand.vmem [shape: f32[16,64], index: 0, kind: input, shape index: {}]   ;;  %s279_s1 = inlined_call_operand.vmem [shape: f32[64,32], index: 1, kind: input, shape index: {}]   ;;  %s280_s2 = inlined_call_operand.vmem [shape: f32[1,32], index: 2, kind: input, shape index: {}]   ;;  %s281_s3 = inlined_call_operand.hbm [shape: f32[16,32], index: 3, kind: output, shape index: {}]  }
   0x1   :  { %v17_v0 = vld [vmem:[%s279_s1] sm:$0xff]  ;;  %v18_v1 = vld [vmem:[%s279_s1 + $0x8] sm:$0xff]  ;;  %v19_v2 = vld [vmem:[%s279_s1 + $0x10] sm:$0xff] }
   0x2   :  { %v165_v3 = vpack.c.bf16 %v18_v1, %v17_v0  ;;  %v20_v4 = vld [vmem:[%s279_s1 + $0x18] sm:$0xff]  ;;  %v21_v6 = vld [vmem:[%s279_s1 + $0x20] sm:$0xff]  ;;  %v22_v7 = vld [vmem:[%s279_s1 + $0x28] sm:$0xff] }
   0x3   :  { %v169_v5 = vpack.c.bf16 %v20_v4, %v19_v2  ;;  %v15_v8 = vld [vmem:[%s278_s0] sm:$0xff] }
   0x4   :  { %166 = vmatprep.subr.bf16.mxu0 %v165_v3  ;;  %162 = vmatprep.mubr.msk.f32.mxu0 %vm32_vm0, %v15_v8 }
   0x5   :  { %8 = vsyncpa [#allocation3], 0  ;;  %168 = vmatpush3.bf16.msra.mxu0 %v165_v3  ;;  %v173_v9 = vpack.c.bf16 %v22_v7, %v21_v6  ;;  %v23_v10 = vld [vmem:[%s279_s1 + $0x30] sm:$0xff]  ;;  %v24_v11 = vld [vmem:[%s279_s1 + $0x38] sm:$0xff]  ;;  %s208_s7 = smov [#allocation2]   ;;  %vm114_vm1 = vcmask 261120  }
   0x6   :  { %170 = vmatprep.subr.bf16.mxu0 %v169_v5  ;;  %v177_v12 = vpack.c.bf16 %v24_v11, %v23_v10  ;;  %v16_v13 = vld [vmem:[%s278_s0 + $0x8] sm:$0xff]  ;;  %v133_v14 = vld [vmem:[%s280_s2] ss:$0 sm:$0xff]  ;;  %s122_s8 = sshll.u32 %s208_s7, 4  ;;  %s123_s8 = int_to_ptr.vmem [resolvable:$true] %s122_s8 }
   0x7   :  { %s184_s1 = scalar_lea.vmem %s123_s8, 256  ;;  %p189_p1 = scmp.lt.s32.totalorder %s123_s8, %s123_s8 }
   0x8   :  { %p185_p0 = scmp.ne.s32.totalorder %s123_s8, %s184_s1  ;;  %p190_p2 = scmp.lt.s32.totalorder %s184_s1, %s184_s1 }
   0x9   :  { %172 = vmatpush3.bf16.msra.mxu0 %v169_v5 }
   0xa   :  { %174 = vmatprep.subr.bf16.mxu0 %v173_v9  ;;  %p191_p3 = por %p190_p2, %p189_p1 }
   0xc   :  { %p192_p4 = pnand %p191_p3, %p185_p0 }
   0xd   :  { %176 = vmatpush3.bf16.msra.mxu0 %v173_v9 }
   0xe   :  { %178 = vmatprep.subr.bf16.mxu0 %v177_v12 }
  0x11   :  { %180 = vmatpush3.bf16.msra.mxu0 %v177_v12 }
  0x14   :  { %163 = vmatmul.mubr.msk.f32.vlgmr.msra.gmra.mrb[0].mxu0 %vm32_vm0, %v16_v13 }
  0xe7   :  { %v164_v15 = vpop.f32.mrb[0].mxu0 }
  0xe8   :  { %v111_v16 = vadd.f32 %v164_v15, %v133_v14  ;;  %v105_v17 = vpop.f32.mrb[1].mxu0 }
  0xe9   :  { %v106_v18 = vadd.f32 %v133_v14, %v105_v17 }
  0xea   :  { %116 = vst.msk [vmem:[#allocation2 + $0x8] sm:$0xff] %vm114_vm1, %v111_v16 }
  0xeb   :  { %115 = vst.msk [vmem:[#allocation2] sm:$0xff] %vm114_vm1, %v106_v18 }
  0xec   :  { %195 = shalt.err (!%p192_p4)
}
  0xed   :  { %s196_s2 = scalar_lea.hbm %s281_s3, 256 }
  0xee   :  { %p197_p5 = scmp.ne.s32.totalorder %s281_s3, %s196_s2  ;;  %p200_p6 = scmp.lt.u32.totalorder %s196_s2, %s281_s3 }
  0xf0   :  { %p202_p7 = pnand %p200_p6, %p197_p5 }
  0xf2   :  { %205 = shalt.err (!%p202_p7)
}
  0xf3   :  { %s209_s14 = smov 128   ;;  %s210_s15 = smov 8  }
  0xf4   :  { %128 = dma.vmem_to_hbm [thread:$0]  %s123_s8, 256, %s281_s3, [#allocation3], %s209_s14, %s209_s14, %s210_s15  }
  0xf5   :  { %206 = dma.done.wait [#allocation3], 256  }
  0xf6   :  { %207 = vsyncadd [#allocation3], 4294967040 }
  0xf7   :  { %132 = vsyncpa [#allocation3], 1 }

</bundles_post_ra>
